<compile_context>
chip_gen: v7x
topology: tpu7x:2x2x1
jax: 0.10.0
libtpu: 0.0.40
codegen_flags: <defaults>
</compile_context>

<pallas_src>
import functools
import math

import jax
import jax.numpy as jnp
import numpy as np
from jax import lax
from jax.experimental import pallas as pl
from jax.experimental.pallas import tpu as pltpu


# ----------------------------------------------------------------------------
# Helpers
# ----------------------------------------------------------------------------
def _tile(full, pref):
    """Pick a tile size: `pref` if it divides `full`, else the full extent."""
    if full <= pref:
        return full
    return pref if full % pref == 0 else full


# ----------------------------------------------------------------------------
# Tiled linear:  y = x @ w.T + b   (w in PyTorch (N, K) layout, no transpose)
# ----------------------------------------------------------------------------
def _linear_kernel(x_ref, w_ref, b_ref, o_ref, acc_ref):
    kk = pl.program_id(2)

    @pl.when(kk == 0)
    def _():
        acc_ref[...] = jnp.zeros_like(acc_ref)

    # x: (tm, tk), w: (tn, tk) -> contract last dims, accumulate in f32 (MXU).
    acc_ref[...] += lax.dot_general(
        x_ref[...], w_ref[...],
        dimension_numbers=(((1,), (1,)), ((), ())),
        preferred_element_type=jnp.float32)

    @pl.when(kk == pl.num_programs(2) - 1)
    def _():
        o_ref[...] = (acc_ref[...] + b_ref[...]).astype(o_ref.dtype)


def _linear(x2d, w, b, *, out_dtype, tm=256, tn=256, tk=512):
    M, K = x2d.shape
    N = w.shape[0]
    tm, tn, tk = _tile(M, tm), _tile(N, tn), _tile(K, tk)
    grid = (M // tm, N // tn, K // tk)
    return pl.pallas_call(
        _linear_kernel,
        out_shape=jax.ShapeDtypeStruct((M, N), out_dtype),
        grid=grid,
        in_specs=[
            pl.BlockSpec((tm, tk), lambda i, j, kk: (i, kk)),
            pl.BlockSpec((tn, tk), lambda i, j, kk: (j, kk)),
            pl.BlockSpec((1, tn), lambda i, j, kk: (0, j)),
        ],
        out_specs=pl.BlockSpec((tm, tn), lambda i, j, kk: (i, j)),
        scratch_shapes=[pltpu.VMEM((tm, tn), jnp.float32)],
        compiler_params=pltpu.CompilerParams(
            dimension_semantics=("parallel", "parallel", "arbitrary")),
    )(x2d, w, b.reshape(1, N))


# ----------------------------------------------------------------------------
# Flash-style attention: grid (batch, q_tile, kv_tile), online softmax.
# q/k/v arrive as lane-dense (·, S, dim)-style blocks; heads are static lane
# slices inside the kernel (no HBM head transpose, no (H,S,S) scores tensor).
# ----------------------------------------------------------------------------
def _attn_kernel(q_ref, k_ref, v_ref, bias_ref, o_ref, m_ref, l_ref, acc_ref,
                 *, n_heads, head_dim, scale):
    ki = pl.program_id(2)

    @pl.when(ki == 0)
    def _():
        m_ref[...] = jnp.full_like(m_ref, -jnp.inf)
        l_ref[...] = jnp.zeros_like(l_ref)
        acc_ref[...] = jnp.zeros_like(acc_ref)

    q = q_ref[0]         # (tq,  H*D)  bf16
    k = k_ref[0]         # (tkv, H*D)  bf16
    v = v_ref[0]         # (tkv, H*D)  bf16
    bias = bias_ref[0]   # (1,   tkv)  f32 additive mask (0 or -1e30)

    for h in range(n_heads):
        lo, hi = h * head_dim, (h + 1) * head_dim
        q_h, k_h, v_h = q[:, lo:hi], k[:, lo:hi], v[:, lo:hi]

        # scores = (q_h @ k_h^T) * scale + bias   -> (tq, tkv) in f32
        s = lax.dot_general(q_h, k_h, (((1,), (1,)), ((), ())),
                            preferred_element_type=jnp.float32)
        s = s * scale + bias

        m_prev = m_ref[h]                                   # (tq, 1)
        l_prev = l_ref[h]
        m_new = jnp.maximum(m_prev, jnp.max(s, axis=-1, keepdims=True))
        alpha = jnp.exp(m_prev - m_new)
        p = jnp.exp(s - m_new)                              # (tq, tkv) f32
        l_ref[h] = alpha * l_prev + jnp.sum(p, axis=-1, keepdims=True)
        m_ref[h] = m_new

        pv = lax.dot_general(p.astype(v_h.dtype), v_h,
                             (((1,), (0,)), ((), ())),
                             preferred_element_type=jnp.float32)
        acc_ref[:, lo:hi] = alpha * acc_ref[:, lo:hi] + pv

    @pl.when(ki == pl.num_programs(2) - 1)
    def _():
        outs = []
        for h in range(n_heads):
            lo, hi = h * head_dim, (h + 1) * head_dim
            inv = pl.reciprocal(l_ref[h], approx=True)      # EUP, epilogue only
            outs.append(acc_ref[:, lo:hi] * inv)
        # Lane-dense (tq, H*D) store: heads already merged, no wrapper transpose.
        o_ref[0] = jnp.concatenate(outs, axis=-1).astype(o_ref.dtype)


def _attention(q_arr, k_arr, v_arr, bias, *, n_heads, dim, head_dim,
               q_off, k_off, v_off, out_dtype):
    bs, s_q = q_arr.shape[0], q_arr.shape[1]
    s_k = k_arr.shape[1]
    tq = _tile(s_q, 128)
    tkv = _tile(s_k, 128)
    grid = (bs, s_q // tq, s_k // tkv)

    kernel = functools.partial(_attn_kernel, n_heads=n_heads,
                               head_dim=head_dim,
                               scale=1.0 / math.sqrt(head_dim))
    return pl.pallas_call(
        kernel,
        out_shape=jax.ShapeDtypeStruct((bs, s_q, dim), out_dtype),
        grid=grid,
        in_specs=[
            # Feature-block offsets select q / k / v inside a fused QKV array
            # (or select block 0 when separate arrays are passed).
            pl.BlockSpec((1, tq, dim), lambda b, qi, ki: (b, qi, q_off)),
            pl.BlockSpec((1, tkv, dim), lambda b, qi, ki: (b, ki, k_off)),
            pl.BlockSpec((1, tkv, dim), lambda b, qi, ki: (b, ki, v_off)),
            pl.BlockSpec((1, 1, tkv), lambda b, qi, ki: (b, 0, ki)),
        ],
        out_specs=pl.BlockSpec((1, tq, dim), lambda b, qi, ki: (b, qi, 0)),
        scratch_shapes=[
            pltpu.VMEM((n_heads, tq, 1), jnp.float32),   # running max m
            pltpu.VMEM((n_heads, tq, 1), jnp.float32),   # running sum l
            pltpu.VMEM((tq, dim), jnp.float32),          # output accumulator
        ],
        compiler_params=pltpu.CompilerParams(
            dimension_semantics=("parallel", "parallel", "arbitrary")),
    )(q_arr, k_arr, v_arr, bias)


# ----------------------------------------------------------------------------
# Parameter prep (one-time): fused QKV weight, bf16 weights, f32 biases.
# ----------------------------------------------------------------------------
def prepare_params(raw, compute_dtype=jnp.bfloat16):
    p = {
        "qkv_w": jnp.concatenate(
            [raw["q_w"], raw["k_w"], raw["v_w"]], axis=0).astype(compute_dtype),
        "qkv_b": jnp.concatenate(
            [raw["q_b"], raw["k_b"], raw["v_b"]], axis=0).astype(jnp.float32),
        "o_w": raw["o_w"].astype(compute_dtype),
        "o_b": raw["o_b"].astype(jnp.float32),
    }
    for n in ("q", "k", "v"):   # separate weights kept for the non-fused path
        p[f"{n}_w"] = raw[f"{n}_w"].astype(compute_dtype)
        p[f"{n}_b"] = raw[f"{n}_b"].astype(jnp.float32)
    return p


# ----------------------------------------------------------------------------
# Module forward (eval mode).
# ----------------------------------------------------------------------------
def multi_head_self_attention(query, key, value, mask, params, n_heads,
                              compute_dtype=jnp.bfloat16):
    bs, q_len, dim = query.shape
    k_len = key.shape[1]
    head_dim = dim // n_heads

    fused = (query is key) and (key is value) and (dim % 128 == 0)
    if fused:
        # One fused QKV projection: x read from HBM once, 3*dim lane-dense out.
        x = query.reshape(bs * q_len, dim).astype(compute_dtype)
        qkv = _linear(x, params["qkv_w"], params["qkv_b"],
                      out_dtype=compute_dtype).reshape(bs, q_len, 3 * dim)
        q_arr = k_arr = v_arr = qkv
        q_off, k_off, v_off = 0, 1, 2
    else:
        xq = query.reshape(bs * q_len, dim).astype(compute_dtype)
        xk = key.reshape(bs * k_len, dim).astype(compute_dtype)
        xv = value.reshape(bs * k_len, dim).astype(compute_dtype)
        q_arr = _linear(xq, params["q_w"], params["q_b"],
                        out_dtype=compute_dtype).reshape(bs, q_len, dim)
        k_arr = _linear(xk, params["k_w"], params["k_b"],
                        out_dtype=compute_dtype).reshape(bs, k_len, dim)
        v_arr = _linear(xv, params["v_w"], params["v_b"],
                        out_dtype=compute_dtype).reshape(bs, k_len, dim)
        q_off = k_off = v_off = 0

    # Additive mask bias (0 where attended, -1e30 where masked), f32.
    bias = jnp.where(mask == 0, -1e30, 0.0).astype(jnp.float32)
    bias = bias.reshape(bs, 1, k_len)

    # TODO(synk): training-mode attention dropout (pltpu.prng_*) and head_mask
    # are not implemented; eval-mode forward only (dropout == identity).
    ctx = _attention(q_arr, k_arr, v_arr, bias,
                     n_heads=n_heads, dim=dim, head_dim=head_dim,
                     q_off=q_off, k_off=k_off, v_off=v_off,
                     out_dtype=compute_dtype)           # (bs, q_len, dim)

    out = _linear(ctx.reshape(bs * q_len, dim), params["o_w"], params["o_b"],
                  out_dtype=query.dtype)
    return (out.reshape(bs, q_len, dim),)


# ----------------------------------------------------------------------------
# Pure-JAX f32 reference (mirrors the PyTorch module)
# ----------------------------------------------------------------------------
def _reference(query, key, value, mask, raw, n_heads):
    bs, q_len, dim = query.shape
    k_len = key.shape[1]
    dph = dim // n_heads

    def lin(x, w, b):
        return x @ w.T + b

    def shape(x):
        return x.reshape(bs, -1, n_heads, dph).transpose(0, 2, 1, 3)

    q = shape(lin(query, raw["q_w"], raw["q_b"])) * (1.0 / math.sqrt(dph))
    k = shape(lin(key, raw["k_w"], raw["k_b"]))
    v = shape(lin(value, raw["v_w"], raw["v_b"]))
    scores = jnp.einsum("bhqd,bhkd->bhqk", q, k)
    m = (mask == 0).reshape(bs, 1, 1, k_len)
    scores = jnp.where(m, jnp.finfo(scores.dtype).min, scores)
    weights = jax.nn.softmax(scores, axis=-1)
    ctx = jnp.einsum("bhqk,bhkd->bhqd", weights, v)
    ctx = ctx.transpose(0, 2, 1, 3).reshape(bs, q_len, dim)
    return lin(ctx, raw["o_w"], raw["o_b"])


if __name__ == "__main__":
    bs, seq, dim, n_heads = 2, 8, 128, 4

    key0 = jax.random.PRNGKey(0)
    ks = jax.random.split(key0, 10)
    init = lambda k, shp: (0.02 * jax.random.normal(k, shp)).astype(jnp.float32)
    raw = {
        "q_w": init(ks[0], (dim, dim)), "q_b": init(ks[1], (dim,)),
        "k_w": init(ks[2], (dim, dim)), "k_b": init(ks[3], (dim,)),
        "v_w": init(ks[4], (dim, dim)), "v_b": init(ks[5], (dim,)),
        "o_w": init(ks[6], (dim, dim)), "o_b": init(ks[7], (dim,)),
    }
    params = prepare_params(raw)

    # Self-attention: query == key == value (DistilBERT usage).
    hidden = jax.random.normal(ks[8], (bs, seq, dim), dtype=jnp.float32)
    # attention mask (bs, seq): 1 = attend, 0 = masked out (padding)
    mask = jnp.array(
        [[1, 1, 1, 1, 1, 1, 1, 1],
         [1, 1, 1, 1, 1, 0, 0, 0]], dtype=jnp.float32)

    (out,) = multi_head_self_attention(hidden, hidden, hidden, mask, params,
                                       n_heads)
    out = jax.block_until_ready(out)

    ref = _reference(hidden, hidden, hidden, mask, raw, n_heads)
    np.testing.assert_allclose(np.asarray(out), np.asarray(ref),
                               rtol=2e-2, atol=2e-2)

    print("KERNEL_OK")
</pallas_src>

<mosaic_0001>
module attributes {stable_mosaic.version = 11 : i64} {
  func.func @_linear_kernel(%arg0: i32, %arg1: i32, %arg2: i32, %arg3: memref<16x128xbf16, #tpu.memory_space<vmem>>, %arg4: memref<384x128xbf16, #tpu.memory_space<vmem>>, %arg5: memref<1x384xf32, #tpu.memory_space<vmem>>, %arg6: memref<16x384xbf16, #tpu.memory_space<vmem>>, %arg7: memref<16x384xf32, #tpu.memory_space<vmem>>) attributes {dimension_semantics = [#tpu.dimension_semantics<parallel>, #tpu.dimension_semantics<parallel>, #tpu.dimension_semantics<arbitrary>], iteration_bounds = array<i64: 1, 1, 1>, scalar_prefetch = 0 : i64, scratch_operands = 1 : i64, tpu.core_type = #tpu.core_type<tc>, window_params = [{transform_indices = @transform_0, window_bounds = array<i64: 16, 128>}, {transform_indices = @transform_1, window_bounds = array<i64: 384, 128>}, {transform_indices = @transform_2, window_bounds = array<i64: 1, 384>}, {transform_indices = @transform_3, window_bounds = array<i64: 16, 384>}]} {
    %c0_i32 = arith.constant 0 : i32
    %0 = arith.cmpi eq, %arg2, %c0_i32 : i32
    %1 = arith.extui %0 : i1 to i32
    %c0_i32_0 = arith.constant 0 : i32
    %2 = arith.cmpi ne, %1, %c0_i32_0 : i32
    scf.if %2 {
      %cst_10 = arith.constant 0.000000e+00 : f32
      %12 = vector.broadcast %cst_10 : f32 to vector<16x384xf32>
      %c0_11 = arith.constant 0 : index
      %c0_12 = arith.constant 0 : index
      %13 = vector.load %arg7[%c0_11, %c0_12] : memref<16x384xf32, #tpu.memory_space<vmem>>, vector<16x384xf32>
      tpu.vector_store %arg7[%c0_11, %c0_12], %12 {strides = array<i32>} : memref<16x384xf32, #tpu.memory_space<vmem>>, vector<16x384xf32>,
    } else {
    }
    %c0 = arith.constant 0 : index
    %c0_1 = arith.constant 0 : index
    %3 = vector.load %arg7[%c0, %c0_1] : memref<16x384xf32, #tpu.memory_space<vmem>>, vector<16x384xf32>
    %c0_2 = arith.constant 0 : index
    %c0_3 = arith.constant 0 : index
    %4 = vector.load %arg3[%c0_2, %c0_3] : memref<16x128xbf16, #tpu.memory_space<vmem>>, vector<16x128xbf16>
    %c0_4 = arith.constant 0 : index
    %c0_5 = arith.constant 0 : index
    %5 = vector.load %arg4[%c0_4, %c0_5] : memref<384x128xbf16, #tpu.memory_space<vmem>>, vector<384x128xbf16>
    %cst = arith.constant dense<0.000000e+00> : vector<16x384xf32>
    %6 = tpu.matmul %4, %5, %cst {dimension_numbers = #tpu.dot_dimension_numbers<[1], [1], [0], [0], [0, 0, 1, 0], [], []>} : vector<16x128xbf16>, vector<384x128xbf16>, vector<16x384xf32> -> vector<16x384xf32>
    %7 = arith.addf %3, %6 : vector<16x384xf32>
    %c0_6 = arith.constant 0 : index
    %c0_7 = arith.constant 0 : index
    %8 = vector.load %arg7[%c0_6, %c0_7] : memref<16x384xf32, #tpu.memory_space<vmem>>, vector<16x384xf32>
    tpu.vector_store %arg7[%c0_6, %c0_7], %7 {strides = array<i32>} : memref<16x384xf32, #tpu.memory_space<vmem>>, vector<16x384xf32>,
    %c0_i32_8 = arith.constant 0 : i32
    %9 = arith.cmpi eq, %arg2, %c0_i32_8 : i32
    %10 = arith.extui %9 : i1 to i32
    %c0_i32_9 = arith.constant 0 : i32
    %11 = arith.cmpi ne, %10, %c0_i32_9 : i32
    scf.if %11 {
      %c0_10 = arith.constant 0 : index
      %c0_11 = arith.constant 0 : index
      %12 = vector.load %arg7[%c0_10, %c0_11] : memref<16x384xf32, #tpu.memory_space<vmem>>, vector<16x384xf32>
      %c0_12 = arith.constant 0 : index
      %c0_13 = arith.constant 0 : index
      %13 = vector.load %arg5[%c0_12, %c0_13] : memref<1x384xf32, #tpu.memory_space<vmem>>, vector<1x384xf32>
      %14 = vector.broadcast %13 : vector<1x384xf32> to vector<16x384xf32>
      %15 = arith.addf %12, %14 : vector<16x384xf32>
      %16 = arith.truncf %15 : vector<16x384xf32> to vector<16x384xbf16>
      %c0_14 = arith.constant 0 : index
      %c0_15 = arith.constant 0 : index
      %17 = vector.load %arg6[%c0_14, %c0_15] : memref<16x384xbf16, #tpu.memory_space<vmem>>, vector<16x384xbf16>
      tpu.vector_store %arg6[%c0_14, %c0_15], %16 {strides = array<i32>} : memref<16x384xbf16, #tpu.memory_space<vmem>>, vector<16x384xbf16>,
    } else {
    }
    return
  }
  func.func @transform_0(%arg0: i32, %arg1: i32, %arg2: i32) -> (i32, i32) {
    %c0_i32 = arith.constant 0 : i32
    return %arg0, %arg2 : i32, i32
  }
  func.func @transform_1(%arg0: i32, %arg1: i32, %arg2: i32) -> (i32, i32) {
    %c0_i32 = arith.constant 0 : i32
    return %arg1, %arg2 : i32, i32
  }
  func.func @transform_2(%arg0: i32, %arg1: i32, %arg2: i32) -> (i32, i32) {
    %c0_i32 = arith.constant 0 : i32
    %c0_i32_0 = arith.constant 0 : i32
    return %c0_i32, %arg1 : i32, i32
  }
  func.func @transform_3(%arg0: i32, %arg1: i32, %arg2: i32) -> (i32, i32) {
    %c0_i32 = arith.constant 0 : i32
    return %arg0, %arg1 : i32, i32
  }
}

</mosaic_0001>

<bundles_post_ra>
// kernel: tpu_custom_call.1
= control target key start
LH: loop header
LB: loop body
LE: loop exit
PB: predicated region body
PF: predicated region fallthrough
CT: control target
= control target key end

     0   :  { %8 = vsyncpa [#allocation4], 0  ;;  %s684_s0 = inlined_call_operand.hbm [shape: bf16[16,128], index: 0, kind: input, shape index: {}]   ;;  %s685_s1 = inlined_call_operand.hbm [shape: bf16[384,128], index: 1, kind: input, shape index: {}]   ;;  %s686_s2 = inlined_call_operand.vmem [shape: f32[1,384], index: 2, kind: input, shape index: {}]   ;;  %s687_s3 = inlined_call_operand.hbm [shape: bf16[16,384], index: 3, kind: output, shape index: {}]  }
   0x1   :  { %9 = vsyncpa [#allocation7], 0 }
   0x2   :  { %10 = vsyncpa [#allocation5], 0  ;;  %s616_s12 = smov [#allocation3]   ;;  %s544_s16 = scalar_lea.hbm %s684_s0, 128 }
   0x3   :  { %s16_s13 = sshll.u32 %s616_s12, 4  ;;  %p545_p0 = scmp.ne.s32.totalorder %s684_s0, %s544_s16  ;;  %s17_s13 = int_to_ptr.vmem [resolvable:$true] %s16_s13 }
   0x4   :  { %p548_p1 = scmp.lt.u32.totalorder %s544_s16, %s684_s0 }
   0x6   :  { %p550_p2 = pnand %p548_p1, %p545_p0 }
   0x8   :  { %553 = shalt.err (!%p550_p2)
}
   0x9   :  { %s554_s21 = scalar_lea.vmem %s17_s13, 128  ;;  %p559_p4 = scmp.lt.s32.totalorder %s17_s13, %s17_s13 }
   0xa   :  { %p555_p3 = scmp.ne.s32.totalorder %s17_s13, %s554_s21  ;;  %p560_p5 = scmp.lt.s32.totalorder %s554_s21, %s554_s21 }
   0xc   :  { %p561_p6 = por %p560_p5, %p559_p4 }
   0xe   :  { %p562_p7 = pnand %p561_p6, %p555_p3 }
  0x10   :  { %565 = shalt.err (!%p562_p7)
}
  0x11   :  { %s617_s22 = smov 64   ;;  %s618_s23 = smov 4  }
  0x12   :  { %22 = dma.hbm_to_vmem [thread:$0]  %s684_s0, 128, %s17_s13, [#allocation4], %s617_s22, %s617_s22, %s618_s23  }
  0x13   :  { %s619_s26 = smov [#allocation6]   ;;  %s566_s30 = scalar_lea.hbm %s685_s1, 3072 }
  0x14   :  { %s28_s27 = sshll.u32 %s619_s26, 4  ;;  %p567_p8 = scmp.ne.s32.totalorder %s685_s1, %s566_s30  ;;  %s29_s27 = int_to_ptr.vmem [resolvable:$true] %s28_s27 }
  0x15   :  { %p570_p9 = scmp.lt.u32.totalorder %s566_s30, %s685_s1 }
  0x17   :  { %p572_p10 = pnand %p570_p9, %p567_p8 }
  0x19   :  { %575 = shalt.err (!%p572_p10)
}
  0x1a   :  { %s576_s8 = scalar_lea.vmem %s29_s27, 3072  ;;  %p581_p12 = scmp.lt.s32.totalorder %s29_s27, %s29_s27 }
  0x1b   :  { %p577_p11 = scmp.ne.s32.totalorder %s29_s27, %s576_s8  ;;  %p582_p13 = scmp.lt.s32.totalorder %s576_s8, %s576_s8 }
  0x1d   :  { %p583_p0 = por %p582_p13, %p581_p12 }
  0x1f   :  { %p584_p1 = pnand %p583_p0, %p577_p11 }
  0x21   :  { %587 = shalt.err (!%p584_p1)
}
  0x22   :  { %34 = dma.hbm_to_vmem [thread:$0]  %s685_s1, 3072, %s29_s27, [#allocation7], %s617_s22, %s617_s22, %s618_s23  }
  0x23   :  { %610 = dma.done.wait [#allocation4], 128  }
  0x24   :  { %611 = vsyncadd [#allocation4], 4294967168 }
  0x25   :  { %612 = dma.done.wait [#allocation7], 3072  }
  0x26   :  { %613 = vsyncadd [#allocation7], 4294964224  ;;  %v620_v0 = vmov 0.0   ;;  %vm621_vm0 = vmmov 0   ;;  %v519_v1 = vld [vmem:[#allocation6 + $0x40] sm:$0xff]   ;;  %v522_v4 = vld [vmem:[#allocation6 + $0x48] sm:$0xff]   ;;  %v367_v26 = vlaneseq }
  0x27   :  { %490 = vmatprep.subr.bf16.mxu1 %v620_v0  ;;  %506 = vmatprep.mubr.msk.bf16.mxu1 %vm621_vm0, %v620_v0  ;;  %v520_v2 = vld [vmem:[#allocation6 + $0x80] sm:$0xff]   ;;  %v523_v5 = vld [vmem:[#allocation6 + $0x88] sm:$0xff]   ;;  %v525_v7 = vld [vmem:[#allocation6 + $0x50] sm:$0xff]   ;;  %s622_s11 = smov [#allocation8]  }
  0x28   :  { %463 = vmatprep.subr.bf16.mxu0 %v519_v1  ;;  %v521_v3 = vld [vmem:[#allocation6] sm:$0xff]   ;;  %491 = vmatpush3.bf16.xpose.msra.mxu1 %v520_v2  ;;  %v524_v6 = vld [vmem:[#allocation6 + $0x8] sm:$0xff]   ;;  %v526_v8 = vld [vmem:[#allocation6 + $0x90] sm:$0xff]   ;;  %v368_v27 = vshrl.u32 %v367_v26, 7  ;;  %s417_s12 = sshll.u32 %s622_s11, 4  ;;  %s418_s12 = int_to_ptr.vmem [resolvable:$true] %s417_s12 }
  0x29   :  { %464 = vmatpush3.bf16.xpose.msra.mxu0 %v521_v3  ;;  %492 = vmatprep.subr.bf16.mxu1 %v620_v0  ;;  %v527_v9 = vld [vmem:[#allocation6 + $0x10] sm:$0xff]   ;;  %v528_v10 = vld [vmem:[#allocation6 + $0x58] sm:$0xff]   ;;  %v531_v14 = vld [vmem:[#allocation6 + $0x60] sm:$0xff]   ;;  %p593_p3 = scmp.lt.s32.totalorder %s418_s12, %s418_s12 }
  0x2a   :  { %465 = vmatprep.subr.bf16.mxu0 %v522_v4  ;;  %v529_v11 = vld [vmem:[#allocation6 + $0x98] sm:$0xff]   ;;  %v532_v15 = vld [vmem:[#allocation6 + $0xa0] sm:$0xff]   ;;  %v534_v17 = vld [vmem:[#allocation6 + $0x68] sm:$0xff]   ;;  %v377_v28 = vsub.s32 2, %v368_v27  ;;  %v369_v30 = vsub.s32 0, %v368_v27  ;;  %v373_v31 = vsub.s32 1, %v368_v27 }
  0x2b   :  { %v530_v12 = vld [vmem:[#allocation6 + $0x18] sm:$0xff]   ;;  %v533_v16 = vld [vmem:[#allocation6 + $0x20] sm:$0xff]   ;;  %v535_v18 = vld [vmem:[#allocation6 + $0xa8] sm:$0xff]  }
  0x2c   :  { %v543_v13 = vld [vmem:[#allocation3] sm:$0xff]   ;;  %v536_v19 = vld [vmem:[#allocation6 + $0x28] sm:$0xff]   ;;  %v537_v20 = vld [vmem:[#allocation6 + $0x70] sm:$0xff]  }
  0x2d   :  { %479 = vmatprep.mubr.bf16.mxu0 %v543_v13  ;;  %v538_v21 = vld [vmem:[#allocation6 + $0xb0] sm:$0xff]   ;;  %v540_v23 = vld [vmem:[#allocation6 + $0x78] sm:$0xff]  }
  0x2e   :  { %v539_v22 = vld [vmem:[#allocation6 + $0x30] sm:$0xff]   ;;  %v541_v24 = vld [vmem:[#allocation6 + $0xb8] sm:$0xff]  }
  0x2f   :  { %v542_v25 = vld [vmem:[#allocation6 + $0x38] sm:$0xff]  }
  0x30   :  { %493 = vmatpush3.bf16.xpose.msra.mxu1 %v523_v5  ;;  %v365_v29 = vld [vmem:[%s686_s2] sm:$0x7]  ;;  %s588_s2 = scalar_lea.vmem %s418_s12, 384 }
  0x31   :  { %466 = vmatpush3.bf16.xpose.msra.mxu0 %v524_v6  ;;  %494 = vmatprep.subr.bf16.mxu1 %v620_v0  ;;  %v378_v32 = vrot.slane %v365_v29, %v377_v28  ;;  %v370_v33 = vrot.slane %v365_v29, %v369_v30  ;;  %v374_v34 = vrot.slane %v365_v29, %v373_v31  ;;  %p589_p2 = scmp.ne.s32.totalorder %s418_s12, %s588_s2  ;;  %p594_p4 = scmp.lt.s32.totalorder %s588_s2, %s588_s2 }
  0x32   :  { %467 = vmatprep.subr.bf16.mxu0 %v525_v7 }
  0x33   :  { %p595_p5 = por %p594_p4, %p593_p3 }
  0x35   :  { %p596_p6 = pnand %p595_p5, %p589_p2 }
  0x38   :  { %495 = vmatpush3.bf16.xpose.msra.mxu1 %v526_v8 }
  0x39   :  { %468 = vmatpush3.bf16.xpose.msra.mxu0 %v527_v9  ;;  %496 = vmatprep.subr.bf16.mxu1 %v620_v0 }
  0x3a   :  { %469 = vmatprep.subr.bf16.mxu0 %v528_v10 }
  0x40   :  { %497 = vmatpush3.bf16.xpose.msra.mxu1 %v529_v11 }
  0x41   :  { %470 = vmatpush3.bf16.xpose.msra.mxu0 %v530_v12  ;;  %498 = vmatprep.subr.bf16.mxu1 %v620_v0 }
  0x42   :  { %471 = vmatprep.subr.bf16.mxu0 %v531_v14 }
  0x48   :  { %499 = vmatpush3.bf16.xpose.msra.mxu1 %v532_v15 }
  0x49   :  { %472 = vmatpush3.bf16.xpose.msra.mxu0 %v533_v16  ;;  %500 = vmatprep.subr.bf16.mxu1 %v620_v0 }
  0x4a   :  { %473 = vmatprep.subr.bf16.mxu0 %v534_v17 }
  0x50   :  { %501 = vmatpush3.bf16.xpose.msra.mxu1 %v535_v18 }
  0x51   :  { %474 = vmatpush3.bf16.xpose.msra.mxu0 %v536_v19  ;;  %502 = vmatprep.subr.bf16.mxu1 %v620_v0 }
  0x52   :  { %475 = vmatprep.subr.bf16.mxu0 %v537_v20 }
  0x58   :  { %503 = vmatpush3.bf16.xpose.msra.mxu1 %v538_v21 }
  0x59   :  { %476 = vmatpush3.bf16.xpose.msra.mxu0 %v539_v22  ;;  %504 = vmatprep.subr.bf16.mxu1 %v620_v0 }
  0x5a   :  { %477 = vmatprep.subr.bf16.mxu0 %v540_v23 }
  0x60   :  { %505 = vmatpush3.bf16.xpose.msra.mxu1 %v541_v24 }
  0x61   :  { %478 = vmatpush3.bf16.xpose.msra.mxu0 %v542_v25 }
  0x67   :  { %507 = vmatmul.mubr.bf16.vlgmr.msra.gmra.mrb[0].mxu1 %v543_v13 }
  0x68   :  { %480 = vmatmul.mubr.bf16.vlgmr.msra.gmra.mrb[0].mxu0 %v543_v13 }
 0x13a   :  { %v337_v35 = vpop.f32.mrb[0].mxu1 }
 0x13b   :  { %v384_v36 = vadd.f32 %v378_v32, %v337_v35  ;;  %v294_v37 = vpop.f32.mrb[0].mxu0  ;;  %v508_v38 = vpop.f32.mrb[1].mxu1 }
 0x13c   :  { %v382_v39 = vadd.f32 %v370_v33, %v294_v37  ;;  %v296_v40 = vpop.f32.mrb[1].mxu0  ;;  %v340_v41 = vpop.f32.mrb[2].mxu1 }
 0x13d   :  { %v460_v42 = vpack.c.bf16 %v384_v36, %v384_v36  ;;  %v383_v43 = vadd.f32 %v374_v34, %v296_v40  ;;  %v387_v44 = vadd.f32 %v378_v32, %v340_v41  ;;  %v298_v45 = vpop.f32.mrb[2].mxu0  ;;  %v509_v46 = vpop.f32.mrb[3].mxu1 }
 0x13e   :  { %v385_v47 = vadd.f32 %v370_v33, %v298_v45  ;;  %v300_v48 = vpop.f32.mrb[3].mxu0 }
 0x13f   :  { %409 = vst [vmem:[#allocation8 + $0x8] sm:$0xf] %v460_v42  ;;  %v459_v49 = vpack.c.bf16 %v383_v43, %v382_v39  ;;  %v462_v50 = vpack.c.bf16 %v387_v44, %v387_v44  ;;  %v386_v51 = vadd.f32 %v374_v34, %v300_v48 }
 0x141   :  { %408 = vst [vmem:[#allocation8] sm:$0xff] %v459_v49  ;;  %411 = vst [vmem:[#allocation8 + $0x14] sm:$0xf] %v462_v50  ;;  %v461_v52 = vpack.c.bf16 %v386_v51, %v385_v47 }
 0x143   :  { %410 = vst [vmem:[#allocation8 + $0xc] sm:$0xff] %v461_v52 }
 0x144   :  { %599 = shalt.err (!%p596_p6)
}
 0x145   :  { %s600_s15 = scalar_lea.hbm %s687_s3, 384 }
 0x146   :  { %p601_p7 = scmp.ne.s32.totalorder %s687_s3, %s600_s15  ;;  %p604_p8 = scmp.lt.u32.totalorder %s600_s15, %s687_s3 }
 0x148   :  { %p606_p9 = pnand %p604_p8, %p601_p7 }
 0x14a   :  { %609 = shalt.err (!%p606_p9)
}
 0x14b   :  { %s623_s20 = smov 192   ;;  %s624_s21 = smov 12  }
 0x14c   :  { %423 = dma.vmem_to_hbm [thread:$0]  %s418_s12, 384, %s687_s3, [#allocation5], %s623_s20, %s623_s20, %s624_s21  }
 0x14d   :  { %614 = dma.done.wait [#allocation5], 384  }
 0x14e   :  { %615 = vsyncadd [#allocation5], 4294966912 }
 0x14f   :  { %427 = vsyncpa [#allocation4], 1 }
 0x150   :  { %428 = vsyncpa [#allocation7], 1 }
 0x151   :  { %429 = vsyncpa [#allocation5], 1 }

</bundles_post_ra>
